<compile_context>
chip_gen: v6e
topology: v6e:2x2x1
jax: 0.10.0
libtpu: 0.0.40
codegen_flags: <defaults>
</compile_context>

<pallas_src>
import functools
import math

import jax
import jax.numpy as jnp
from jax.experimental import pallas as pl
from jax.experimental.pallas import tpu as pltpu

_LANE = 128
_SUBLANE = 8


def _round_up(x, m):
    return ((x + m - 1) // m) * m


def _round_down(x, m):
    return (x // m) * m


# ----------------------------------------------------------------------------
# Kernel
# ----------------------------------------------------------------------------
def _hnn_kernel(num_layers, *refs):
    """Feature-major HNN forward for one batch tile.

    refs (all 2-D VMEM refs):
      refs[0]                      x^T tile with ones row   (input_dim+1, TB)
      refs[1]                      [W_0 | b_0]              (hidden, input_dim+1)
      refs[2 : 2+2*(L-2)]          W_l, b_l  for l = 1..L-2
      next (L-2) refs              W_l^T     for l = 1..L-2
      refs[idx]                    M0 = J @ W_0^T, row-padded (out_rows, hidden), f32
      refs[idx+1]                  w_last^T                  (hidden, 1), f32
      refs[idx+2]                  output tile               (out_rows, TB)
    """
    L = num_layers
    n_mid = L - 2
    x_ref = refs[0]
    w0_ref = refs[1]
    wb = refs[2:2 + 2 * n_mid]
    wt = refs[2 + 2 * n_mid:2 + 3 * n_mid]
    m0_ref = refs[2 + 3 * n_mid]
    wlastT_ref = refs[3 + 3 * n_mid]
    out_ref = refs[4 + 3 * n_mid]

    def mm(w, act):
        # Weights are pre-cast in the wrapper; only the activation stream is
        # cast here (no-op on the default f32 path).  f32 accumulation always.
        return jnp.dot(w, act.astype(w.dtype), preferred_element_type=jnp.float32)

    # ---- forward pass of the Hamiltonian MLP, saving tanh activations ----
    acts = [jnp.tanh(mm(w0_ref[...], x_ref[...]))]          # bias folded into W0_aug
    for l in range(n_mid):
        acts.append(jnp.tanh(mm(wb[2 * l][...], acts[-1]) + wb[2 * l + 1][...]))
    # H itself is never used by HNN.forward (only grad_x H); the last Linear's
    # bias drops out of the gradient, so neither is loaded.

    # ---- analytic reverse pass: grad of H.sum() w.r.t. x (tanh' = 1 - a^2) ----
    g = wlastT_ref[...]                                      # (hidden, 1) seed
    for l in range(n_mid, 0, -1):
        a_l = acts[l]
        g = mm(wt[l - 1][...], (1.0 - a_l * a_l) * g)        # (hidden, TB)
    a0 = acts[0]
    delta0 = (1.0 - a0 * a0) * g                             # (hidden, TB)

    # ---- symplectic rotation fused into the final backward matmul (f32) ----
    # out^T = J @ gradH^T = (J @ W_0^T) @ delta0 = M0 @ delta0
    out_ref[...] = mm(m0_ref[...], delta0)                   # (out_rows, TB)


# ----------------------------------------------------------------------------
# Tiling / budgeting helpers
# ----------------------------------------------------------------------------
def _estimate_vmem_bytes(in_rows, out_rows, hidden, num_layers, tb):
    f32 = 4
    io = 2 * 2 * (in_rows + out_rows) * tb * f32             # double-buffered x / out tiles
    live = (num_layers + 1) * hidden * tb * f32              # tanh acts + delta/g temps
    consts = 2 * f32 * (hidden * in_rows
                        + (num_layers - 2) * (2 * hidden * hidden + hidden)
                        + out_rows * hidden + hidden)
    return io + live + consts


def _choose_batch_tile(batch, block_batch, in_rows, out_rows, hidden, num_layers,
                       min_grid_steps, vmem_budget_bytes=24 * 1024 * 1024):
    padded128 = _round_up(max(batch, 1), _LANE)
    tb = min(_round_up(block_batch, _LANE), padded128)
    # Keep >= min_grid_steps grid steps (when the batch allows) so v7x's two
    # TensorCores both get work under dimension_semantics=("parallel",).
    if min_grid_steps > 1:
        cap = max(_round_down(padded128 // min_grid_steps, _LANE), _LANE)
        tb = min(tb, cap)
    # Conservative VMEM budget (binding on v7x's 64 MiB; loose on v5e/v6e).
    while tb > _LANE and _estimate_vmem_bytes(in_rows, out_rows, hidden,
                                              num_layers, tb) > vmem_budget_bytes:
        tb = max(_round_down(tb // 2, _LANE), _LANE)
    padded = _round_up(batch, tb)
    return tb, padded


def _cost_estimate(padded_batch, in_rows, out_rows, hidden, num_layers, weight_bytes):
    n_mid = num_layers - 2
    flops = 2 * padded_batch * (hidden * in_rows              # layer-0 fwd (bias folded)
                                + 2 * n_mid * hidden * hidden  # mid fwd + bwd
                                + out_rows * hidden)           # fused (J@W0^T) bwd
    transcendentals = (num_layers - 1) * hidden * padded_batch
    bytes_accessed = 4 * padded_batch * (in_rows + out_rows) + weight_bytes
    return pl.CostEstimate(flops=int(flops),
                           transcendentals=int(transcendentals),
                           bytes_accessed=int(bytes_accessed))


# ----------------------------------------------------------------------------
# Wrappers
# ----------------------------------------------------------------------------
def hnn_forward_feature_major(xT, weights, biases, J, *, block_batch=2048,
                              compute_dtype=None, min_grid_steps=2):
    """Feature-major entry point: xT is (input_dim, batch); returns (J@gradH^T)."""
    input_dim, batch = xT.shape
    L = len(weights)
    hidden = weights[0].shape[0]
    if compute_dtype is None:
        # MXU is nowhere near binding for small hidden widths; bf16 only pays
        # off (on v6e/v7x) once the contraction dims are large.
        compute_dtype = jnp.bfloat16 if hidden >= 256 else jnp.float32

    in_rows = input_dim + 1                      # ones row folds the first bias
    out_rows = _round_up(input_dim, _SUBLANE)    # full-sublane, unmasked stores

    tb, padded = _choose_batch_tile(batch, block_batch, in_rows, out_rows,
                                    hidden, L, min_grid_steps)

    x_aug = jnp.concatenate(
        [xT.astype(jnp.float32), jnp.ones((1, batch), jnp.float32)], axis=0)
    x_aug = jnp.pad(x_aug, ((0, 0), (0, padded - batch)))

    # Constants: pre-cast ONCE in the wrapper (no per-grid-step VPU converts).
    w0_aug = jnp.concatenate([weights[0], biases[0].reshape(-1, 1)],
                             axis=1).astype(compute_dtype)
    const_args = [w0_aug]
    for l in range(1, L - 1):
        const_args.append(weights[l].astype(compute_dtype))
        const_args.append(biases[l].reshape(-1, 1).astype(jnp.float32))
    for l in range(1, L - 1):
        const_args.append(weights[l].T.astype(compute_dtype))
    # M0 = J @ W_0^T folds the symplectic rotation; keep the final matmul in
    # f32 even on the bf16 path (limits compounding rounding error).
    m0 = jnp.pad((J @ weights[0].T).astype(jnp.float32),
                 ((0, out_rows - input_dim), (0, 0)))
    const_args.append(m0)
    const_args.append(weights[-1].T.reshape(-1, 1).astype(jnp.float32))

    in_specs = [pl.BlockSpec((in_rows, tb), lambda i: (0, i))]
    # Constant index maps: DMA'd once, VMEM-resident across all batch steps.
    in_specs += [pl.BlockSpec(a.shape, lambda i: (0, 0)) for a in const_args]

    weight_bytes = sum(int(math.prod(a.shape)) * a.dtype.itemsize
                       for a in const_args)

    kernel = functools.partial(_hnn_kernel, L)
    outT = pl.pallas_call(
        kernel,
        out_shape=jax.ShapeDtypeStruct((out_rows, padded), jnp.float32),
        grid=(padded // tb,),
        in_specs=in_specs,
        out_specs=pl.BlockSpec((out_rows, tb), lambda i: (0, i)),
        compiler_params=pltpu.CompilerParams(
            # Batch tiles are independent -> shard across TCs on v7x megacore.
            dimension_semantics=("parallel",),
            # Per-tile footprint is budgeted to < 24 MiB above; 32 MiB scoped
            # VMEM is safe on every generation (raises v5e's 16 MiB default).
            vmem_limit_bytes=32 * 1024 * 1024,
        ),
        cost_estimate=_cost_estimate(padded, in_rows, out_rows, hidden, L,
                                     weight_bytes),
    )(x_aug, *const_args)
    return outT[:input_dim, :batch]


def hnn_forward(x, weights, biases, J, **kwargs):
    """Pallas implementation of HNN.forward(t, x); x is (batch, input_dim)."""
    return hnn_forward_feature_major(x.T, weights, biases, J, **kwargs).T


# ----------------------------------------------------------------------------
# Reference model / init (mirrors the PyTorch module)
# ----------------------------------------------------------------------------
def _build_symplectic_matrix(dim):
    n = dim // 2
    J = jnp.zeros((dim, dim), jnp.float32)
    idx = jnp.arange(n)
    J = J.at[idx, idx + n].set(1.0)
    J = J.at[idx + n, idx].set(-1.0)
    return J


def _init_mlp_params(key, input_dim, hidden_dim, num_layers):
    """Deterministic init matching nn.Linear default U(-1/sqrt(fan_in), +)."""
    dims = [input_dim] + [hidden_dim] * (num_layers - 1) + [1]
    weights, biases = [], []
    for i in range(num_layers):
        fan_in, fan_out = dims[i], dims[i + 1]
        key, kw, kb = jax.random.split(key, 3)
        bound = 1.0 / jnp.sqrt(fan_in)
        weights.append(jax.random.uniform(kw, (fan_out, fan_in), jnp.float32,
                                          -bound, bound))
        biases.append(jax.random.uniform(kb, (fan_out,), jnp.float32,
                                         -bound, bound))
    return weights, biases


def _reference_forward(x, weights, biases, J):
    """Pure-JAX reference (uses jax.grad, mirrors torch.autograd.grad)."""
    def hamiltonian_sum(xx):
        a = xx
        for l in range(len(weights) - 1):
            a = jnp.tanh(a @ weights[l].T + biases[l])
        H = a @ weights[-1].T + biases[-1]
        return jnp.sum(H)
    gradH = jax.grad(hamiltonian_sum)(x)
    return gradH @ J.T


if __name__ == "__main__":
    input_dim = 4      # must be even for the symplectic matrix
    hidden_dim = 32
    num_layers = 3
    batch = 200        # exercises tail padding and a 2-step batch grid

    key = jax.random.PRNGKey(0)
    key, kx = jax.random.split(key)
    x = jax.random.normal(kx, (batch, input_dim), jnp.float32)

    weights, biases = _init_mlp_params(key, input_dim, hidden_dim, num_layers)
    J = _build_symplectic_matrix(input_dim)

    ref = _reference_forward(x, weights, biases, J)

    # Default path (f32 compute at hidden=32): exact match vs jax.grad ref.
    out = jax.block_until_ready(hnn_forward(x, weights, biases, J))
    assert out.shape == (batch, input_dim)
    assert jnp.allclose(out, ref, atol=1e-5, rtol=1e-5), "f32 mismatch vs ref"

    # Single-grid-step path (batch fits one 128-wide lane tile).
    out_small = jax.block_until_ready(hnn_forward(x[:96], weights, biases, J))
    assert jnp.allclose(out_small, ref[:96], atol=1e-5, rtol=1e-5), \
        "small-batch mismatch vs ref"

    # bf16-on-MXU path (only worthwhile for large hidden; run here for coverage).
    out_bf16 = jax.block_until_ready(
        hnn_forward(x, weights, biases, J, compute_dtype=jnp.bfloat16))
    assert jnp.allclose(out_bf16, ref, atol=5e-2, rtol=5e-2), "bf16 mismatch"

    print("KERNEL_OK")
</pallas_src>

<mosaic_0001>
module attributes {stable_mosaic.version = 11 : i64} {
  func.func @_hnn_kernel(%arg0: i32, %arg1: memref<5x128xf32, #tpu.memory_space<vmem>>, %arg2: memref<32x5xf32, #tpu.memory_space<vmem>>, %arg3: memref<32x32xf32, #tpu.memory_space<vmem>>, %arg4: memref<32x1xf32, #tpu.memory_space<vmem>>, %arg5: memref<32x32xf32, #tpu.memory_space<vmem>>, %arg6: memref<8x32xf32, #tpu.memory_space<vmem>>, %arg7: memref<32x1xf32, #tpu.memory_space<vmem>>, %arg8: memref<8x128xf32, #tpu.memory_space<vmem>>) attributes {dimension_semantics = [#tpu.dimension_semantics<parallel>], iteration_bounds = array<i64: 2>, scalar_prefetch = 0 : i64, scratch_operands = 0 : i64, tpu.core_type = #tpu.core_type<tc>, window_params = [{transform_indices = @transform_0, window_bounds = array<i64: 5, 128>}, {pipeline_mode = #tpu.pipeline_mode<synchronous>, transform_indices = @transform_1, window_bounds = array<i64: 32, 5>}, {pipeline_mode = #tpu.pipeline_mode<synchronous>, transform_indices = @transform_2, window_bounds = array<i64: 32, 32>}, {pipeline_mode = #tpu.pipeline_mode<synchronous>, transform_indices = @transform_3, window_bounds = array<i64: 32, 1>}, {pipeline_mode = #tpu.pipeline_mode<synchronous>, transform_indices = @transform_4, window_bounds = array<i64: 32, 32>}, {pipeline_mode = #tpu.pipeline_mode<synchronous>, transform_indices = @transform_5, window_bounds = array<i64: 8, 32>}, {pipeline_mode = #tpu.pipeline_mode<synchronous>, transform_indices = @transform_6, window_bounds = array<i64: 32, 1>}, {transform_indices = @transform_7, window_bounds = array<i64: 8, 128>}]} {
    %c0 = arith.constant 0 : index
    %c0_0 = arith.constant 0 : index
    %0 = vector.load %arg2[%c0, %c0_0] : memref<32x5xf32, #tpu.memory_space<vmem>>, vector<32x5xf32>
    %c0_1 = arith.constant 0 : index
    %c0_2 = arith.constant 0 : index
    %1 = vector.load %arg1[%c0_1, %c0_2] : memref<5x128xf32, #tpu.memory_space<vmem>>, vector<5x128xf32>
    %cst = arith.constant dense<0.000000e+00> : vector<32x128xf32>
    %2 = tpu.matmul %0, %1, %cst {dimension_numbers = #tpu.dot_dimension_numbers<[1], [0], [0], [1], [0, 0, 1, 1], [], []>} : vector<32x5xf32>, vector<5x128xf32>, vector<32x128xf32> -> vector<32x128xf32>
    %3 = math.tanh %2 : vector<32x128xf32>
    %c0_3 = arith.constant 0 : index
    %c0_4 = arith.constant 0 : index
    %4 = vector.load %arg3[%c0_3, %c0_4] : memref<32x32xf32, #tpu.memory_space<vmem>>, vector<32x32xf32>
    %cst_5 = arith.constant dense<0.000000e+00> : vector<32x128xf32>
    %5 = tpu.matmul %4, %3, %cst_5 {dimension_numbers = #tpu.dot_dimension_numbers<[1], [0], [0], [1], [0, 0, 1, 1], [], []>} : vector<32x32xf32>, vector<32x128xf32>, vector<32x128xf32> -> vector<32x128xf32>
    %c0_6 = arith.constant 0 : index
    %c0_7 = arith.constant 0 : index
    %6 = vector.load %arg4[%c0_6, %c0_7] : memref<32x1xf32, #tpu.memory_space<vmem>>, vector<32x1xf32>
    %7 = vector.broadcast %6 : vector<32x1xf32> to vector<32x128xf32>
    %8 = arith.addf %5, %7 : vector<32x128xf32>
    %9 = math.tanh %8 : vector<32x128xf32>
    %c0_8 = arith.constant 0 : index
    %c0_9 = arith.constant 0 : index
    %10 = vector.load %arg7[%c0_8, %c0_9] : memref<32x1xf32, #tpu.memory_space<vmem>>, vector<32x1xf32>
    %c0_10 = arith.constant 0 : index
    %c0_11 = arith.constant 0 : index
    %11 = vector.load %arg5[%c0_10, %c0_11] : memref<32x32xf32, #tpu.memory_space<vmem>>, vector<32x32xf32>
    %12 = arith.mulf %9, %9 : vector<32x128xf32>
    %cst_12 = arith.constant 1.000000e+00 : f32
    %13 = vector.broadcast %cst_12 : f32 to vector<32x128xf32>
    %14 = arith.subf %13, %12 : vector<32x128xf32>
    %15 = vector.broadcast %10 : vector<32x1xf32> to vector<32x128xf32>
    %16 = arith.mulf %14, %15 : vector<32x128xf32>
    %cst_13 = arith.constant dense<0.000000e+00> : vector<32x128xf32>
    %17 = tpu.matmul %11, %16, %cst_13 {dimension_numbers = #tpu.dot_dimension_numbers<[1], [0], [0], [1], [0, 0, 1, 1], [], []>} : vector<32x32xf32>, vector<32x128xf32>, vector<32x128xf32> -> vector<32x128xf32>
    %18 = arith.mulf %3, %3 : vector<32x128xf32>
    %cst_14 = arith.constant 1.000000e+00 : f32
    %19 = vector.broadcast %cst_14 : f32 to vector<32x128xf32>
    %20 = arith.subf %19, %18 : vector<32x128xf32>
    %21 = arith.mulf %20, %17 : vector<32x128xf32>
    %c0_15 = arith.constant 0 : index
    %c0_16 = arith.constant 0 : index
    %22 = vector.load %arg6[%c0_15, %c0_16] : memref<8x32xf32, #tpu.memory_space<vmem>>, vector<8x32xf32>
    %cst_17 = arith.constant dense<0.000000e+00> : vector<8x128xf32>
    %23 = tpu.matmul %22, %21, %cst_17 {dimension_numbers = #tpu.dot_dimension_numbers<[1], [0], [0], [1], [0, 0, 1, 1], [], []>} : vector<8x32xf32>, vector<32x128xf32>, vector<8x128xf32> -> vector<8x128xf32>
    %c0_18 = arith.constant 0 : index
    %c0_19 = arith.constant 0 : index
    %24 = vector.load %arg8[%c0_18, %c0_19] : memref<8x128xf32, #tpu.memory_space<vmem>>, vector<8x128xf32>
    tpu.vector_store %arg8[%c0_18, %c0_19], %23 {strides = array<i32>} : memref<8x128xf32, #tpu.memory_space<vmem>>, vector<8x128xf32>,
    return
  }
  func.func @transform_0(%arg0: i32) -> (i32, i32) {
    %c0_i32 = arith.constant 0 : i32
    %c0_i32_0 = arith.constant 0 : i32
    return %c0_i32, %arg0 : i32, i32
  }
  func.func @transform_1(%arg0: i32) -> (i32, i32) {
    %c0_i32 = arith.constant 0 : i32
    %c0_i32_0 = arith.constant 0 : i32
    %c0_i32_1 = arith.constant 0 : i32
    return %c0_i32, %c0_i32_0 : i32, i32
  }
  func.func @transform_2(%arg0: i32) -> (i32, i32) {
    %c0_i32 = arith.constant 0 : i32
    %c0_i32_0 = arith.constant 0 : i32
    %c0_i32_1 = arith.constant 0 : i32
    return %c0_i32, %c0_i32_0 : i32, i32
  }
  func.func @transform_3(%arg0: i32) -> (i32, i32) {
    %c0_i32 = arith.constant 0 : i32
    %c0_i32_0 = arith.constant 0 : i32
    %c0_i32_1 = arith.constant 0 : i32
    return %c0_i32, %c0_i32_0 : i32, i32
  }
  func.func @transform_4(%arg0: i32) -> (i32, i32) {
    %c0_i32 = arith.constant 0 : i32
    %c0_i32_0 = arith.constant 0 : i32
    %c0_i32_1 = arith.constant 0 : i32
    return %c0_i32, %c0_i32_0 : i32, i32
  }
  func.func @transform_5(%arg0: i32) -> (i32, i32) {
    %c0_i32 = arith.constant 0 : i32
    %c0_i32_0 = arith.constant 0 : i32
    %c0_i32_1 = arith.constant 0 : i32
    return %c0_i32, %c0_i32_0 : i32, i32
  }
  func.func @transform_6(%arg0: i32) -> (i32, i32) {
    %c0_i32 = arith.constant 0 : i32
    %c0_i32_0 = arith.constant 0 : i32
    %c0_i32_1 = arith.constant 0 : i32
    return %c0_i32, %c0_i32_0 : i32, i32
  }
  func.func @transform_7(%arg0: i32) -> (i32, i32) {
    %c0_i32 = arith.constant 0 : i32
    %c0_i32_0 = arith.constant 0 : i32
    return %c0_i32, %arg0 : i32, i32
  }
}

</mosaic_0001>

<bundles_post_ra>
// kernel: tpu_custom_call.1
= control target key start
LH: loop header
LB: loop body
LE: loop exit
PB: predicated region body
PF: predicated region fallthrough
CT: control target
= control target key end

     0   :  { %12 = vsyncpa [#allocation3], 0  ;;  %s1270_s0 = inlined_call_operand.vmem [shape: f32[5,256], index: 0, kind: input, shape index: {}]   ;;  %s1271_s1 = inlined_call_operand.vmem [shape: f32[32,5], index: 1, kind: input, shape index: {}]   ;;  %s1272_s2 = inlined_call_operand.vmem [shape: f32[32,32], index: 2, kind: input, shape index: {}]   ;;  %s1273_s3 = inlined_call_operand.vmem [shape: f32[32,1], index: 3, kind: input, shape index: {}]   ;;  %s1274_s4 = inlined_call_operand.vmem [shape: f32[32,32], index: 4, kind: input, shape index: {}]   ;;  %s1275_s5 = inlined_call_operand.vmem [shape: f32[8,32], index: 5, kind: input, shape index: {}]   ;;  %s1276_s6 = inlined_call_operand.vmem [shape: f32[32,1], index: 6, kind: input, shape index: {}]   ;;  %s1277_s7 = inlined_call_operand.hbm [shape: f32[8,256], index: 7, kind: output, shape index: {}]  }
   0x1   :  { %14 = vsyncpa [#allocation3 + $0x1], 0  ;;  %s1075_s24 = smov 0   ;;  %s1077_s25 = smov 0  }
   0x2   :  { %s1079_s26 = smov 0   ;;  %s1081_s27 = smov 0  }
   0x3 LB: > { %s1096_s28 = sadd.s32 4294967295, %s1029_s27   ;;  %s812_s29 = sadd.s32 4294967294, %s1029_s27   ;;  %s1029_s27 = sphi %s1081_s27, %s1283_s27   ;;  %s1025_s26 = sphi %s1079_s26, %s1282_s26   ;;  %s1021_s25 = sphi %s1077_s25, %s1281_s25   ;;  %s1017_s24 = sphi %s1075_s24, %s1280_s24  }
   0x4   : > { %s1100_s30 = sadd.s32 1, %s1029_s27   ;;  %s179_s8 = sadd.s32 1, %s1025_s26 }
   0x5   : > { %s176_s9 = ssub.s32 %s1029_s27, %s1100_s30  ;;  %p189_p0 = scmp.ne.s32.totalorder %s1025_s26, %s1021_s25 }
   0x6   : > { %p177_p1 = scmp.eq.s32.totalorder %s176_s9, 0  ;;  %p190_p2 = scmp.eq.s32.totalorder %s1096_s28, 1 }
   0x7   : > { %p195_p3 = scmp.ne.s32.totalorder %s1021_s25, %s1017_s24  ;;  %p196_p4 = scmp.eq.s32.totalorder %s812_s29, 1 }
   0x8   : > { %s1111_s10 = scalar_select %p177_p1, %s1025_s26, %s179_s8  }
   0x9   : > { %p1113_p5 = por %p190_p2, %p189_p0  ;;  %p1117_p6 = por %p196_p4, %p195_p3 }
   0xa   : > { %p815_p7 = scmp.ge.s32.totalorder %s1029_s27, 1  ;;  %p239_p8 = scmp.lt.s32.totalorder %s1029_s27, 3 }
   0xc   : > { %p240_p9 = pnand %p815_p7, %p239_p8 }
   0xd   : > { %p270_p10 = scmp.lt.s32.totalorder (!%p240_p9), %s1096_s28, 1  ;;  %s267_s18 = sand.u32 (!%p240_p9), 1, %s1021_s25  }
   0xe   : > { %243 = sbr.rel (%p240_p9) target bundleno = 885 (0x375), region = 48  ;;  %s833_s22 = sshll.u32 (!%p240_p9), %s1096_s28, 7 }
   0xf   : > { %s1231_s8 = scalar_lea.hbm (!%p240_p9), %s1277_s7, %s833_s22  ;;  %s740_s9 = scalar_lea.sflag (!%p240_p9), [#allocation3], %s267_s18 }
  0x13   : > { %v274_v0 = vld [vmem:[%s1271_s1] sm:$0xff]  ;;  %vm279_vm0 = vcmask 39936   ;;  %s271_s15 = scalar_select %p270_p10, %s1096_s28, 1  ;;  %vm292_vm1 = vcmask 1044480   ;;  %v275_v2 = vld [vmem:[%s1271_s1 + $0x8] sm:$0xff]  ;;  %v276_v3 = vld [vmem:[%s1271_s1 + $0x10] sm:$0xff] }
  0x14   : > { %864 = vmatprep.mubr.msk.f32.mxu0 %vm279_vm0, %v274_v0  ;;  %v277_v4 = vld [vmem:[%s1271_s1 + $0x18] sm:$0xff]  ;;  %v385_v5 = vld [vmem:[%s1272_s2] sm:$0xff]  ;;  %vm413_vm2 = vcmask 261120   ;;  %v390_v7 = vld [vmem:[%s1273_s3 + $0x8] sm:$0xff]  ;;  %v1031_v8 = vmov 0   ;;  %v1032_v62 = vmov 0.0  }
  0x15   : > { %s817_s16 = sshll.u32 %s271_s15, 3  ;;  %878 = vmatprep.mubr.msk.f32.mxu1 %vm413_vm2, %v385_v5  ;;  %v392_v6 = vld [vmem:[%s1273_s3 + $0x18] sm:$0xff]  ;;  %951 = vset.pattern.permute.xlu0 %v1031_v8  ;;  %v391_v9 = vld [vmem:[%s1273_s3 + $0x10] sm:$0xff]  ;;  %v389_v10 = vld [vmem:[%s1273_s3] sm:$0xff]  ;;  %vm1033_vm3 = vmmov 0   ;;  %s1034_s28 = smov [#allocation2]  }
  0x16   : > { %s273_s19 = scalar_lea.vmem %s1270_s0, %s817_s16  ;;  %952 = vset.pattern.permute.xlu1 %v1031_v8  ;;  %410 = vperm.xlu0 %951, %v392_v6   ;;  %v518_v11 = vld [vmem:[%s1276_s6 + $0x18] sm:$0xff]  ;;  %v517_v12 = vld [vmem:[%s1276_s6 + $0x10] sm:$0xff]  ;;  %v516_v13 = vld [vmem:[%s1276_s6 + $0x8] sm:$0xff]  ;;  %s973_s14 = sshll.u32 %s1034_s28, 4  ;;  %s974_s14 = int_to_ptr.vmem [resolvable:$false] %s973_s14 }
  0x17   : > { %v278_v1 = vld [vmem:[%s273_s19] sm:$0x1f]  ;;  %400 = vperm.xlu1 %952, %v390_v7   ;;  %v386_v23 = vld [vmem:[%s1272_s2 + $0x8] sm:$0xff]  ;;  %v387_v24 = vld [vmem:[%s1272_s2 + $0x10] sm:$0xff]  ;;  %s816_s19 = sshll.u32 %s267_s18, 3  ;;  %s975_s15 = scalar_lea.vmem %s974_s14, 256 }
  0x18   : > { %862 = vmatprep.subr.msk.mxu0 %vm292_vm1, %v278_v1  ;;  %v515_v14 = vld [vmem:[%s1276_s6] sm:$0xff]  ;;  %v388_v25 = vld [vmem:[%s1272_s2 + $0x18] sm:$0xff]  ;;  %v520_v59 = vld [vmem:[%s1274_s4 + $0x8] sm:$0xff]  ;;  %s269_s20 = scalar_lea.vmem [#allocation2], %s816_s19 }
  0x19   : > { %863 = vmatpush3.msk.msra.mxu0 %vm292_vm1, %v278_v1  ;;  %v519_v26 = vld [vmem:[%s1274_s4] sm:$0xff]  ;;  %v521_v60 = vld [vmem:[%s1274_s4 + $0x10] sm:$0xff]  ;;  %v522_v61 = vld [vmem:[%s1274_s4 + $0x18] sm:$0xff]  ;;  %s753_s21 = sshll.u32 %s269_s20, 4  ;;  %s1226_s21 = int_to_ptr.vmem [resolvable:$true] %s753_s21 }
  0x1a   : > { %865 = vmatmul.mubr.msk.f32.vlgmr.msra.gmra.mxu0 %vm279_vm0, %v275_v2  ;;  %405 = vperm.xlu0 %951, %v391_v9   ;;  %s969_s13 = scalar_lea.vmem %s1226_s21, 128  ;;  %p976_p0 = scmp.lt.s32.totalorder %s1226_s21, %s974_s14 }
  0x1b   : > { %867 = vmatprep.mubr.msk.f32.mxu0 %vm279_vm0, %v276_v3  ;;  %395 = vperm.xlu1 %952, %v389_v10   ;;  %p970_p11 = scmp.ne.s32.totalorder %s1226_s21, %s969_s13  ;;  %p977_p1 = scmp.lt.s32.totalorder %s975_s15, %s969_s13 }
  0x1d   : > { %p971_p12 = pnand %p970_p11, %p1113_p5  ;;  %p978_p2 = por %p977_p1, %p976_p0 }
  0x1e   : > { %868 = vmatmul.mubr.msk.f32.gmra.mxu0 %vm279_vm0, %v277_v4  ;;  %548 = vperm.xlu0 %951, %v518_v11  }
  0x1f   : > { %543 = vperm.xlu1 %952, %v517_v12   ;;  %892 = vmatprep.mubr.msk.f32.mxu0 %vm413_vm2, %v519_v26  ;;  %p972_p13 = pneg %p971_p12 }
  0x21   : > { %p979_p3 = pnand %p978_p2, %p972_p13 }
  0x22   : > { %538 = vperm.xlu0 %951, %v516_v13  }
  0x23   : > { %533 = vperm.xlu1 %952, %v515_v14  }
  0x91   : > { %v411_v28 = vpop.permute.xlu0 %410 }
  0x92   : > { %v401_v27 = vpop.permute.xlu1 %400 }
  0x95   : > { %v406_v36 = vpop.permute.xlu0 %405 }
  0x96   : > { %v396_v31 = vpop.permute.xlu1 %395 }
  0x99   : > { %v549_v45 = vpop.permute.xlu0 %548 }
  0x9a   : > { %v544_v49 = vpop.permute.xlu1 %543 }
  0x9d   : > { %v539_v55 = vpop.permute.xlu0 %538 }
  0x9e   : > { %v534_v57 = vpop.permute.xlu1 %533 }
  0xda   : > { %v866_v15 = vpop.f32.mrf.mxu0 }
  0xdc   : > { %v362_v16 = vpop.f32.mrf.mxu0 }
  0xde   : > { %v869_v17 = vpop.f32.mrf.mxu0 }
  0xdf   : > { %953 = vtanh.f32 %v869_v17 }
  0xe0   : > { %v372_v18 = vpop.f32.mrf.mxu0 }
  0xe1   : > { %955 = vtanh.f32 %v372_v18 }
  0xe2   : > { %957 = vtanh.f32 %v866_v15  ;;  %v664_v15 = vld [vmem:[%s1275_s5] sm:$0xff] }
  0xe3   : > { %959 = vtanh.f32 %v362_v16 }
  0xec   : > { %v1168_v19 = vpop.eup %953 }
  0xed   : > { %870 = vmatprep.subr.mxu1 %v1168_v19  ;;  %v655_v63 = vmul.f32 %v1168_v19, %v1168_v19 }
  0xee   : > { %v1171_v20 = vpop.eup %955  ;;  %871 = vmatpush3.msra.mxu1 %v1168_v19 }
  0xef   : > { %872 = vmatprep.subr.mxu1 %v1171_v20  ;;  %v1175_v21 = vpop.eup %957  ;;  %v654_v1 = vmul.f32 %v1171_v20, %v1171_v20  ;;  %v659_v4 = vsub.f32 1.0, %v655_v63 }
  0xf0   : > { %873 = vmatpush3.msra.mxu1 %v1171_v20  ;;  %v1179_v22 = vpop.eup %959  ;;  %v653_v3 = vmul.f32 %v1175_v21, %v1175_v21 }
  0xf1   : > { %874 = vmatprep.subr.mxu1 %v1175_v21  ;;  %v652_v6 = vmul.f32 %v1179_v22, %v1179_v22  ;;  %v658_v8 = vsub.f32 1.0, %v654_v1 }
  0xf2   : > { %875 = vmatpush3.msra.mxu1 %v1175_v21  ;;  %v657_v10 = vsub.f32 1.0, %v653_v3 }
  0xf3   : > { %876 = vmatprep.subr.mxu1 %v1179_v22  ;;  %v656_v13 = vsub.f32 1.0, %v652_v6 }
  0xf4   : > { %877 = vmatpush3.msra.mxu1 %v1179_v22 }
  0xf5   : > { %879 = vmatmul.mubr.msk.f32.vlgmr.msra.gmra.mxu1 %vm413_vm2, %v386_v23  ;;  %898 = vmatprep.subr.mxu1 %v1032_v62 }
  0xf6   : > { %881 = vmatprep.mubr.msk.f32.mxu1 %vm413_vm2, %v387_v24 }
  0xf9   : > { %882 = vmatmul.mubr.msk.f32.gmra.mxu1 %vm413_vm2, %v388_v25 }
  0xfa   : > { %906 = vmatprep.mubr.msk.f32.mxu1 %vm1033_vm3, %v1032_v62 }
 0x1b5   : > { %v880_v29 = vpop.f32.mrf.mxu1 }
 0x1b6   : > { %v498_v30 = vadd.f32 %v880_v29, %v401_v27 }
 0x1b7   : > { %v492_v32 = vpop.f32.mrf.mxu1 }
 0x1b8   : > { %v493_v33 = vadd.f32 %v492_v32, %v396_v31  ;;  %961 = vtanh.f32 %v498_v30 }
 0x1b9   : > { %v883_v34 = vpop.f32.mrf.mxu1 }
 0x1ba   : > { %v508_v35 = vadd.f32 %v883_v34, %v411_v28  ;;  %963 = vtanh.f32 %v493_v33 }
 0x1bb   : > { %v502_v37 = vpop.f32.mrf.mxu1 }
 0x1bc   : > { %965 = vtanh.f32 %v508_v35  ;;  %v503_v38 = vadd.f32 %v502_v37, %v406_v36 }
 0x1be   : > { %967 = vtanh.f32 %v503_v38 }
 0x1c5   : > { %v962_v39 = vpop.eup %961 }
 0x1c6   : > { %v524_v42 = vmul.f32 %v962_v39, %v962_v39 }
 0x1c7   : > { %v964_v40 = vpop.eup %963 }
 0x1c8   : > { %v523_v47 = vmul.f32 %v964_v40, %v964_v40  ;;  %v528_v50 = vsub.f32 1.0, %v524_v42 }
 0x1c9   : > { %v966_v41 = vpop.eup %965 }
 0x1ca   : > { %v526_v43 = vmul.f32 %v966_v41, %v966_v41  ;;  %v527_v53 = vsub.f32 1.0, %v523_v47  ;;  %v552_v56 = vmul.f32 %v539_v55, %v528_v50 }
 0x1cb   : > { %v968_v44 = vpop.eup %967 }
 0x1cc   : > { %v530_v46 = vsub.f32 1.0, %v526_v43  ;;  %v525_v48 = vmul.f32 %v968_v44, %v968_v44  ;;  %v551_v58 = vmul.f32 %v534_v57, %v527_v53 }
 0x1ce   : > { %v529_v51 = vsub.f32 1.0, %v525_v48  ;;  %v554_v52 = vmul.f32 %v549_v45, %v530_v46 }
 0x1d0   : > { %884 = vmatprep.subr.mxu0 %v554_v52  ;;  %v553_v54 = vmul.f32 %v544_v49, %v529_v51 }
 0x1d1   : > { %885 = vmatpush3.msra.mxu0 %v554_v52 }
 0x1d2   : > { %886 = vmatprep.subr.mxu0 %v553_v54 }
 0x1d3   : > { %887 = vmatpush3.msra.mxu0 %v553_v54 }
 0x1d4   : > { %888 = vmatprep.subr.mxu0 %v552_v56 }
 0x1d5   : > { %889 = vmatpush3.msra.mxu0 %v552_v56 }
 0x1d6   : > { %890 = vmatprep.subr.mxu0 %v551_v58 }
 0x1d7   : > { %891 = vmatpush3.msra.mxu0 %v551_v58 }
 0x1d8   : > { %893 = vmatmul.mubr.msk.f32.vlgmr.msra.gmra.mxu0 %vm413_vm2, %v520_v59 }
 0x1d9   : > { %895 = vmatprep.mubr.msk.f32.mxu0 %vm413_vm2, %v521_v60 }
 0x1dc   : > { %896 = vmatmul.mubr.msk.f32.gmra.mxu0 %vm413_vm2, %v522_v61 }
 0x298   : > { %v894_v0 = vpop.f32.mrf.mxu0 }
 0x299   : > { %v661_v12 = vmul.f32 %v894_v0, %v657_v10 }
 0x29a   : > { %v633_v2 = vpop.f32.mrf.mxu0 }
 0x29b   : > { %v660_v14 = vmul.f32 %v656_v13, %v633_v2 }
 0x29c   : > { %v897_v5 = vpop.f32.mrf.mxu0 }
 0x29d   : > { %v663_v7 = vmul.f32 %v897_v5, %v659_v4 }
 0x29e   : > { %v643_v9 = vpop.f32.mrf.mxu0 }
 0x29f   : > { %v662_v11 = vmul.f32 %v658_v8, %v643_v9  ;;  %899 = vmatpush3.msra.mxu1 %v663_v7 }
 0x2a0   : > { %900 = vmatprep.subr.mxu1 %v1032_v62 }
 0x2a1   : > { %901 = vmatpush3.msra.mxu1 %v662_v11 }
 0x2a2   : > { %902 = vmatprep.subr.mxu1 %v1032_v62 }
 0x2a3   : > { %903 = vmatpush3.msra.mxu1 %v661_v12 }
 0x2a4   : > { %904 = vmatprep.subr.mxu1 %v1032_v62 }
 0x2a5   : > { %905 = vmatpush3.msra.mxu1 %v660_v14 }
 0x2a6   : > { %907 = vmatmul.mubr.msk.f32.vlgmr.msra.gmra.mxu1 %vm413_vm2, %v664_v15 }
 0x366   : > { %v734_v16 = vpop.f32.mrf.mxu1 }
 0x367   : > { %738 = vst [vmem:[%s269_s20] sm:$0xff] %v734_v16 }
 0x368   : > { %v908_v17 = vpop.f32.mrf.mxu1 }
 0x369   : > { %982 = shalt.err (!%p979_p3)
}
 0x36a   : > { %s983_s16 = scalar_lea.hbm %s1231_s8, 128  ;;  %s987_s19 = scalar_lea.hbm %s1277_s7, 256 }
 0x36b   : > { %p984_p4 = scmp.ne.s32.totalorder %s1231_s8, %s983_s16  ;;  %p988_p9 = scmp.lt.s32.totalorder %s1231_s8, %s1277_s7 }
 0x36c   : > { %p989_p10 = scmp.lt.s32.totalorder %s987_s19, %s983_s16 }
 0x36d   : > { %p985_p7 = pnand %p984_p4, %p1113_p5 }
 0x36e   : > { %p990_p11 = por %p989_p10, %p988_p9 }
 0x36f   : > { %p986_p8 = pneg %p985_p7 }
 0x371   : > { %p991_p12 = pnand %p990_p11, %p986_p8 }
 0x373   : > { %994 = shalt.err (!%p991_p12)
}
 0x374   : > { %909 = dma.vmem_to_hbm [thread:$0]  (%p1113_p5), %s1226_s21, 128, %s1231_s8, %s740_s9  }
 0x375 PF: > { %p915_p13 = scmp.ge.s32.totalorder %s1029_s27, 2  ;;  %s765_s23 = sand.u32 1, %s1017_s24  }
 0x376   : > { %s766_s29 = scalar_lea.sflag [#allocation3], %s765_s23 }
 0x377   : > { %p912_p0 = pnand %p915_p13, %p1117_p6 }
 0x379   : > { %p913_p1 = pneg %p912_p0 }
 0x37b   : > { %1012 = dma.done.wait (%p913_p1), %s766_s29, 128  }
 0x37c   : > { %1014 = vsyncadd (%p913_p1), %s766_s29, 4294967168  ;;  %p17_p2 = scmp.ge.s32.totalorder %s1100_s30, 4   ;;  %s1280_s24 = smov %s1021_s25 }
 0x37d   : > { %s1281_s25 = smov %s1025_s26  ;;  %s1282_s26 = smov %s1111_s10 }
 0x37e   : > { %s1283_s27 = smov %s1100_s30  ;;  %19 = sbr.rel (!%p17_p2) target bundleno = 3 (0x3), region = 83 }
 0x383   :  { %771 = vsyncpa [#allocation3], 1 }
 0x384   :  { %773 = vsyncpa [#allocation3 + $0x1], 1 }

</bundles_post_ra>
